<compile_context>
chip_gen: v7x
topology: tpu7x:2x2x1
jax: 0.10.0
libtpu: 0.0.40
codegen_flags: <defaults>
</compile_context>

<pallas_src>
import functools

import jax
import jax.numpy as jnp
import numpy as np
from jax import lax
from jax.experimental import pallas as pl
from jax.experimental.pallas import tpu as pltpu


# --------------------------------------------------------------------------
# Pallas kernel: one batch-block per grid step, layout (Bb, C, H*W)
# --------------------------------------------------------------------------
def _dwconv_kernel(x_ref, w_ref, out_ref, xbuf_ref, *, C, H, W, K, margin):
    total = H * W
    pad = K // 2
    KK = K * K
    Bb = out_ref.shape[0]

    # Build the haloed activation buffer in VMEM:
    #   [ zeros(margin) | x (total) | zeros(margin) ]   along the lane axis.
    # margin is a multiple of 128 -> all three stores are lane-aligned.
    if margin > 0:
        zeros_halo = jnp.zeros((Bb, C, margin), jnp.float32)
        xbuf_ref[:, :, :margin] = zeros_halo
        xbuf_ref[:, :, margin + total:] = zeros_halo
    xbuf_ref[:, :, margin:margin + total] = x_ref[...]

    w = w_ref[...]                                  # (C, K*K + 1)
    shift = w[:, KK:KK + 1][None]                   # (1, C, 1) folded BN shift

    # column index along the flattened spatial axis (sublane-broadcast later)
    col = lax.broadcasted_iota(jnp.int32, (1, 1, total), 2) % W

    acc = jnp.zeros((Bb, C, total), jnp.float32)
    # Group taps by horizontal offset dx: one wrap-select per dx instead of
    # one per tap.  Row overflow is handled for free by the zero halo.
    for kw in range(K):
        dx = kw - pad
        part = jnp.zeros((Bb, C, total), jnp.float32)
        for kh in range(K):
            dy = kh - pad
            start = margin + dy * W + dx                      # static offset
            win = xbuf_ref[:, :, start:start + total]         # (Bb, C, total)
            tap = w[:, kh * K + kw:kh * K + kw + 1][None]     # (1, C, 1)
            part = part + win * tap
        if dx > 0:
            part = jnp.where(col < (W - dx), part, 0.0)
        elif dx < 0:
            part = jnp.where(col >= (-dx), part, 0.0)
        acc = acc + part

    y = acc + shift                     # BN scale already folded into taps
    out_ref[...] = (y * jax.nn.sigmoid(y)).astype(out_ref.dtype)   # SiLU


# --------------------------------------------------------------------------
# wrapper: layout plumbing (flatten spatial, fold BN into taps, single block)
# --------------------------------------------------------------------------
def dwconv_forward(x, weight, gamma, beta, mean, var, *, eps=1e-5,
                   batch_block=None):
    B, C, H, W = x.shape
    Cout, cin_per_group, K, K2 = weight.shape
    assert K == K2 and K % 2 == 1, (
        "only odd kernel sizes (PyTorch padding=K//2, stride=1 keeps shape)")
    assert Cout == C and cin_per_group == 1, (
        "only depth-multiplier-1 depthwise conv (out_channels == in_channels)")

    total = H * W
    pad = K // 2
    margin_min = pad * W + pad               # flat halo needed for row shifts
    margin = ((margin_min + 127) // 128) * 128 if margin_min > 0 else 0

    Bb = B if batch_block is None else min(batch_block, B)
    assert B % Bb == 0, "batch_block must divide batch"

    # channels on sublanes, flattened spatial on lanes (NCHW reshape is free)
    x_flat = x.astype(jnp.float32).reshape(B, C, total)

    # fold BN running stats: scale goes into the taps, shift rides along as
    # an extra column of the (single) invariant operand.
    scale = gamma.astype(jnp.float32) / jnp.sqrt(var.astype(jnp.float32) + eps)
    shift = beta.astype(jnp.float32) - mean.astype(jnp.float32) * scale
    w_taps = weight.astype(jnp.float32)[:, 0].reshape(C, K * K) * scale[:, None]
    w_all = jnp.concatenate([w_taps, shift[:, None]], axis=1)   # (C, K*K + 1)

    kern = functools.partial(_dwconv_kernel, C=C, H=H, W=W, K=K, margin=margin)
    out_flat = pl.pallas_call(
        kern,
        grid=(B // Bb,),
        in_specs=[
            pl.BlockSpec((Bb, C, total), lambda b: (b, 0, 0)),
            pl.BlockSpec((C, K * K + 1), lambda b: (0, 0)),
        ],
        out_specs=pl.BlockSpec((Bb, C, total), lambda b: (b, 0, 0)),
        out_shape=jax.ShapeDtypeStruct((B, C, total), jnp.float32),
        scratch_shapes=[pltpu.VMEM((Bb, C, total + 2 * margin), jnp.float32)],
        compiler_params=pltpu.CompilerParams(
            dimension_semantics=("parallel",)),
    )(x_flat, w_all)

    return out_flat.reshape(B, C, H, W)             # back to NCHW (free reshape)


# --------------------------------------------------------------------------
# pure-JAX reference (mirrors the PyTorch forward, eval-mode BN)
# --------------------------------------------------------------------------
def dwconv_reference(x, weight, gamma, beta, mean, var, eps=1e-5):
    C = x.shape[1]
    K = weight.shape[-1]
    y = lax.conv_general_dilated(
        x.astype(jnp.float32), weight.astype(jnp.float32),
        window_strides=(1, 1), padding=[(K // 2, K // 2)] * 2,
        dimension_numbers=('NCHW', 'OIHW', 'NCHW'),
        feature_group_count=C, precision=lax.Precision.HIGHEST)
    scale = gamma / jnp.sqrt(var + eps)
    shift = beta - mean * scale
    y = y * scale[None, :, None, None] + shift[None, :, None, None]
    return y * jax.nn.sigmoid(y)


# --------------------------------------------------------------------------
if __name__ == "__main__":
    B, C, H, W = 2, 16, 16, 16
    base_key = jax.random.PRNGKey(0)

    for K in (3, 5):                      # DWConv(16, 16, 3) and DWConv(16, 16, 5)
        ks = jax.random.split(jax.random.fold_in(base_key, K), 6)
        x = jax.random.normal(ks[0], (B, C, H, W), jnp.float32)
        weight = 0.3 * jax.random.normal(ks[1], (C, 1, K, K), jnp.float32)
        gamma = 1.0 + 0.1 * jax.random.normal(ks[2], (C,), jnp.float32)
        beta = 0.1 * jax.random.normal(ks[3], (C,), jnp.float32)
        mean = 0.1 * jax.random.normal(ks[4], (C,), jnp.float32)
        var = jax.random.uniform(ks[5], (C,), jnp.float32, 0.5, 1.5)

        out = jax.jit(dwconv_forward)(x, weight, gamma, beta, mean, var)
        out = jax.block_until_ready(out)

        ref = dwconv_reference(x, weight, gamma, beta, mean, var)
        np.testing.assert_allclose(np.asarray(out), np.asarray(ref),
                                   rtol=1e-4, atol=1e-4)

    print("KERNEL_OK")
</pallas_src>

<mosaic_0001>
module attributes {stable_mosaic.version = 11 : i64} {
  func.func @_dwconv_kernel(%arg0: i32, %arg1: memref<2x16x256xf32, #tpu.memory_space<vmem>>, %arg2: memref<16x10xf32, #tpu.memory_space<vmem>>, %arg3: memref<2x16x256xf32, #tpu.memory_space<vmem>>, %arg4: memref<2x16x512xf32, #tpu.memory_space<vmem>>) attributes {dimension_semantics = [#tpu.dimension_semantics<parallel>], iteration_bounds = array<i64: 1>, scalar_prefetch = 0 : i64, scratch_operands = 1 : i64, tpu.core_type = #tpu.core_type<tc>, window_params = [{transform_indices = @transform_0, window_bounds = array<i64: 2, 16, 256>}, {pipeline_mode = #tpu.pipeline_mode<synchronous>, transform_indices = @transform_1, window_bounds = array<i64: 16, 10>}, {transform_indices = @transform_2, window_bounds = array<i64: 2, 16, 256>}]} {
    %cst = arith.constant 0.000000e+00 : f32
    %0 = vector.broadcast %cst : f32 to vector<2x16x128xf32>
    %c0 = arith.constant 0 : index
    %c0_0 = arith.constant 0 : index
    %c0_1 = arith.constant 0 : index
    %1 = vector.load %arg4[%c0, %c0_0, %c0_1] : memref<2x16x512xf32, #tpu.memory_space<vmem>>, vector<2x16x128xf32>
    tpu.vector_store %arg4[%c0, %c0_0, %c0_1], %0 {strides = array<i32>} : memref<2x16x512xf32, #tpu.memory_space<vmem>>, vector<2x16x128xf32>,
    %c0_2 = arith.constant 0 : index
    %c0_3 = arith.constant 0 : index
    %c384 = arith.constant 384 : index
    %2 = vector.load %arg4[%c0_2, %c0_3, %c384] : memref<2x16x512xf32, #tpu.memory_space<vmem>>, vector<2x16x128xf32>
    tpu.vector_store %arg4[%c0_2, %c0_3, %c384], %0 {strides = array<i32>} : memref<2x16x512xf32, #tpu.memory_space<vmem>>, vector<2x16x128xf32>,
    %c0_4 = arith.constant 0 : index
    %c0_5 = arith.constant 0 : index
    %c0_6 = arith.constant 0 : index
    %3 = vector.load %arg1[%c0_4, %c0_5, %c0_6] : memref<2x16x256xf32, #tpu.memory_space<vmem>>, vector<2x16x256xf32>
    %c0_7 = arith.constant 0 : index
    %c0_8 = arith.constant 0 : index
    %c128 = arith.constant 128 : index
    %4 = vector.load %arg4[%c0_7, %c0_8, %c128] : memref<2x16x512xf32, #tpu.memory_space<vmem>>, vector<2x16x256xf32>
    tpu.vector_store %arg4[%c0_7, %c0_8, %c128], %3 {strides = array<i32>} : memref<2x16x512xf32, #tpu.memory_space<vmem>>, vector<2x16x256xf32>,
    %c0_9 = arith.constant 0 : index
    %c0_10 = arith.constant 0 : index
    %5 = vector.load %arg2[%c0_9, %c0_10] : memref<16x10xf32, #tpu.memory_space<vmem>>, vector<16x10xf32>
    %6 = vector.extract_strided_slice %5 {offsets = [0, 9], sizes = [16, 1], strides = [1, 1]} : vector<16x10xf32> to vector<16x1xf32>
    %7 = vector.shape_cast %6 : vector<16x1xf32> to vector<1x16x1xf32>
    %8 = tpu.iota {dimensions = array<i32: 2>} : vector<1x1x256xi32>
    %c16_i32 = arith.constant 16 : i32
    %c0_i32 = arith.constant 0 : i32
    %9 = arith.cmpi eq, %c16_i32, %c0_i32 : i32
    %c1_i32 = arith.constant 1 : i32
    %10 = arith.select %9, %c1_i32, %c16_i32 : i32
    %11 = vector.broadcast %10 : i32 to vector<1x1x256xi32>
    %12 = arith.remsi %8, %11 : vector<1x1x256xi32>
    %c0_i32_11 = arith.constant 0 : i32
    %13 = vector.broadcast %c0_i32_11 : i32 to vector<1x1x256xi32>
    %14 = arith.cmpi ne, %12, %13 : vector<1x1x256xi32>
    %c0_i32_12 = arith.constant 0 : i32
    %15 = vector.broadcast %c0_i32_12 : i32 to vector<1x1x256xi32>
    %16 = arith.cmpi slt, %12, %15 : vector<1x1x256xi32>
    %c0_i32_13 = arith.constant 0 : i32
    %17 = arith.cmpi slt, %10, %c0_i32_13 : i32
    %18 = vector.broadcast %17 : i1 to vector<1x1x256xi1>
    %19 = vector.broadcast %18 : vector<1x1x256xi1> to vector<1x1x256xi1>
    %20 = arith.xori %16, %19 : vector<1x1x256xi1>
    %21 = arith.andi %20, %14 : vector<1x1x256xi1>
    %22 = vector.broadcast %10 : i32 to vector<1x1x256xi32>
    %23 = arith.addi %12, %22 : vector<1x1x256xi32>
    %24 = arith.select %21, %23, %12 : vector<1x1x256xi1>, vector<1x1x256xi32>
    %cst_14 = arith.constant 0.000000e+00 : f32
    %25 = vector.broadcast %cst_14 : f32 to vector<2x16x256xf32>
    %cst_15 = arith.constant 0.000000e+00 : f32
    %26 = vector.broadcast %cst_15 : f32 to vector<2x16x256xf32>
    %c0_16 = arith.constant 0 : index
    %c0_17 = arith.constant 0 : index
    %c111 = arith.constant 111 : index
    %27 = vector.load %arg4[%c0_16, %c0_17, %c111] : memref<2x16x512xf32, #tpu.memory_space<vmem>>, vector<2x16x256xf32>
    %28 = vector.extract_strided_slice %5 {offsets = [0, 0], sizes = [16, 1], strides = [1, 1]} : vector<16x10xf32> to vector<16x1xf32>
    %29 = vector.shape_cast %28 : vector<16x1xf32> to vector<1x16x1xf32>
    %30 = vector.broadcast %29 : vector<1x16x1xf32> to vector<2x16x256xf32>
    %31 = arith.mulf %27, %30 : vector<2x16x256xf32>
    %32 = arith.addf %26, %31 : vector<2x16x256xf32>
    %c0_18 = arith.constant 0 : index
    %c0_19 = arith.constant 0 : index
    %c127 = arith.constant 127 : index
    %33 = vector.load %arg4[%c0_18, %c0_19, %c127] : memref<2x16x512xf32, #tpu.memory_space<vmem>>, vector<2x16x256xf32>
    %34 = vector.extract_strided_slice %5 {offsets = [0, 3], sizes = [16, 1], strides = [1, 1]} : vector<16x10xf32> to vector<16x1xf32>
    %35 = vector.shape_cast %34 : vector<16x1xf32> to vector<1x16x1xf32>
    %36 = vector.broadcast %35 : vector<1x16x1xf32> to vector<2x16x256xf32>
    %37 = arith.mulf %33, %36 : vector<2x16x256xf32>
    %38 = arith.addf %32, %37 : vector<2x16x256xf32>
    %c0_20 = arith.constant 0 : index
    %c0_21 = arith.constant 0 : index
    %c143 = arith.constant 143 : index
    %39 = vector.load %arg4[%c0_20, %c0_21, %c143] : memref<2x16x512xf32, #tpu.memory_space<vmem>>, vector<2x16x256xf32>
    %40 = vector.extract_strided_slice %5 {offsets = [0, 6], sizes = [16, 1], strides = [1, 1]} : vector<16x10xf32> to vector<16x1xf32>
    %41 = vector.shape_cast %40 : vector<16x1xf32> to vector<1x16x1xf32>
    %42 = vector.broadcast %41 : vector<1x16x1xf32> to vector<2x16x256xf32>
    %43 = arith.mulf %39, %42 : vector<2x16x256xf32>
    %44 = arith.addf %38, %43 : vector<2x16x256xf32>
    %c1_i32_22 = arith.constant 1 : i32
    %45 = vector.broadcast %c1_i32_22 : i32 to vector<1x1x256xi32>
    %46 = arith.cmpi sge, %24, %45 : vector<1x1x256xi32>
    %cst_23 = arith.constant 0.000000e+00 : f32
    %47 = vector.shape_cast %46 : vector<1x1x256xi1> to vector<1x1x256xi1>
    %48 = vector.broadcast %47 : vector<1x1x256xi1> to vector<2x16x256xi1>
    %49 = vector.broadcast %cst_23 : f32 to vector<2x16x256xf32>
    %50 = arith.select %48, %44, %49 : vector<2x16x256xi1>, vector<2x16x256xf32>
    %51 = arith.addf %25, %50 : vector<2x16x256xf32>
    %cst_24 = arith.constant 0.000000e+00 : f32
    %52 = vector.broadcast %cst_24 : f32 to vector<2x16x256xf32>
    %c0_25 = arith.constant 0 : index
    %c0_26 = arith.constant 0 : index
    %c112 = arith.constant 112 : index
    %53 = vector.load %arg4[%c0_25, %c0_26, %c112] : memref<2x16x512xf32, #tpu.memory_space<vmem>>, vector<2x16x256xf32>
    %54 = vector.extract_strided_slice %5 {offsets = [0, 1], sizes = [16, 1], strides = [1, 1]} : vector<16x10xf32> to vector<16x1xf32>
    %55 = vector.shape_cast %54 : vector<16x1xf32> to vector<1x16x1xf32>
    %56 = vector.broadcast %55 : vector<1x16x1xf32> to vector<2x16x256xf32>
    %57 = arith.mulf %53, %56 : vector<2x16x256xf32>
    %58 = arith.addf %52, %57 : vector<2x16x256xf32>
    %c0_27 = arith.constant 0 : index
    %c0_28 = arith.constant 0 : index
    %c128_29 = arith.constant 128 : index
    %59 = vector.load %arg4[%c0_27, %c0_28, %c128_29] : memref<2x16x512xf32, #tpu.memory_space<vmem>>, vector<2x16x256xf32>
    %60 = vector.extract_strided_slice %5 {offsets = [0, 4], sizes = [16, 1], strides = [1, 1]} : vector<16x10xf32> to vector<16x1xf32>
    %61 = vector.shape_cast %60 : vector<16x1xf32> to vector<1x16x1xf32>
    %62 = vector.broadcast %61 : vector<1x16x1xf32> to vector<2x16x256xf32>
    %63 = arith.mulf %59, %62 : vector<2x16x256xf32>
    %64 = arith.addf %58, %63 : vector<2x16x256xf32>
    %c0_30 = arith.constant 0 : index
    %c0_31 = arith.constant 0 : index
    %c144 = arith.constant 144 : index
    %65 = vector.load %arg4[%c0_30, %c0_31, %c144] : memref<2x16x512xf32, #tpu.memory_space<vmem>>, vector<2x16x256xf32>
    %66 = vector.extract_strided_slice %5 {offsets = [0, 7], sizes = [16, 1], strides = [1, 1]} : vector<16x10xf32> to vector<16x1xf32>
    %67 = vector.shape_cast %66 : vector<16x1xf32> to vector<1x16x1xf32>
    %68 = vector.broadcast %67 : vector<1x16x1xf32> to vector<2x16x256xf32>
    %69 = arith.mulf %65, %68 : vector<2x16x256xf32>
    %70 = arith.addf %64, %69 : vector<2x16x256xf32>
    %71 = arith.addf %51, %70 : vector<2x16x256xf32>
    %cst_32 = arith.constant 0.000000e+00 : f32
    %72 = vector.broadcast %cst_32 : f32 to vector<2x16x256xf32>
    %c0_33 = arith.constant 0 : index
    %c0_34 = arith.constant 0 : index
    %c113 = arith.constant 113 : index
    %73 = vector.load %arg4[%c0_33, %c0_34, %c113] : memref<2x16x512xf32, #tpu.memory_space<vmem>>, vector<2x16x256xf32>
    %74 = vector.extract_strided_slice %5 {offsets = [0, 2], sizes = [16, 1], strides = [1, 1]} : vector<16x10xf32> to vector<16x1xf32>
    %75 = vector.shape_cast %74 : vector<16x1xf32> to vector<1x16x1xf32>
    %76 = vector.broadcast %75 : vector<1x16x1xf32> to vector<2x16x256xf32>
    %77 = arith.mulf %73, %76 : vector<2x16x256xf32>
    %78 = arith.addf %72, %77 : vector<2x16x256xf32>
    %c0_35 = arith.constant 0 : index
    %c0_36 = arith.constant 0 : index
    %c129 = arith.constant 129 : index
    %79 = vector.load %arg4[%c0_35, %c0_36, %c129] : memref<2x16x512xf32, #tpu.memory_space<vmem>>, vector<2x16x256xf32>
    %80 = vector.extract_strided_slice %5 {offsets = [0, 5], sizes = [16, 1], strides = [1, 1]} : vector<16x10xf32> to vector<16x1xf32>
    %81 = vector.shape_cast %80 : vector<16x1xf32> to vector<1x16x1xf32>
    %82 = vector.broadcast %81 : vector<1x16x1xf32> to vector<2x16x256xf32>
    %83 = arith.mulf %79, %82 : vector<2x16x256xf32>
    %84 = arith.addf %78, %83 : vector<2x16x256xf32>
    %c0_37 = arith.constant 0 : index
    %c0_38 = arith.constant 0 : index
    %c145 = arith.constant 145 : index
    %85 = vector.load %arg4[%c0_37, %c0_38, %c145] : memref<2x16x512xf32, #tpu.memory_space<vmem>>, vector<2x16x256xf32>
    %86 = vector.extract_strided_slice %5 {offsets = [0, 8], sizes = [16, 1], strides = [1, 1]} : vector<16x10xf32> to vector<16x1xf32>
    %87 = vector.shape_cast %86 : vector<16x1xf32> to vector<1x16x1xf32>
    %88 = vector.broadcast %87 : vector<1x16x1xf32> to vector<2x16x256xf32>
    %89 = arith.mulf %85, %88 : vector<2x16x256xf32>
    %90 = arith.addf %84, %89 : vector<2x16x256xf32>
    %c15_i32 = arith.constant 15 : i32
    %91 = vector.broadcast %c15_i32 : i32 to vector<1x1x256xi32>
    %92 = arith.cmpi slt, %24, %91 : vector<1x1x256xi32>
    %cst_39 = arith.constant 0.000000e+00 : f32
    %93 = vector.shape_cast %92 : vector<1x1x256xi1> to vector<1x1x256xi1>
    %94 = vector.broadcast %93 : vector<1x1x256xi1> to vector<2x16x256xi1>
    %95 = vector.broadcast %cst_39 : f32 to vector<2x16x256xf32>
    %96 = arith.select %94, %90, %95 : vector<2x16x256xi1>, vector<2x16x256xf32>
    %97 = arith.addf %71, %96 : vector<2x16x256xf32>
    %98 = vector.broadcast %7 : vector<1x16x1xf32> to vector<2x16x256xf32>
    %99 = arith.addf %97, %98 : vector<2x16x256xf32>
    %100 = arith.negf %99 : vector<2x16x256xf32>
    %101 = math.exp %100 : vector<2x16x256xf32>
    %cst_40 = arith.constant 1.000000e+00 : f32
    %102 = vector.broadcast %cst_40 : f32 to vector<2x16x256xf32>
    %103 = arith.addf %102, %101 : vector<2x16x256xf32>
    %104 = arith.divf %102, %103 : vector<2x16x256xf32>
    %105 = arith.mulf %99, %104 : vector<2x16x256xf32>
    %c0_41 = arith.constant 0 : index
    %c0_42 = arith.constant 0 : index
    %c0_43 = arith.constant 0 : index
    %106 = vector.load %arg3[%c0_41, %c0_42, %c0_43] : memref<2x16x256xf32, #tpu.memory_space<vmem>>, vector<2x16x256xf32>
    tpu.vector_store %arg3[%c0_41, %c0_42, %c0_43], %105 {strides = array<i32>} : memref<2x16x256xf32, #tpu.memory_space<vmem>>, vector<2x16x256xf32>,
    return
  }
  func.func @transform_0(%arg0: i32) -> (i32, i32, i32) {
    %c0_i32 = arith.constant 0 : i32
    %c0_i32_0 = arith.constant 0 : i32
    %c0_i32_1 = arith.constant 0 : i32
    return %arg0, %c0_i32, %c0_i32_0 : i32, i32, i32
  }
  func.func @transform_1(%arg0: i32) -> (i32, i32) {
    %c0_i32 = arith.constant 0 : i32
    %c0_i32_0 = arith.constant 0 : i32
    %c0_i32_1 = arith.constant 0 : i32
    return %c0_i32, %c0_i32_0 : i32, i32
  }
  func.func @transform_2(%arg0: i32) -> (i32, i32, i32) {
    %c0_i32 = arith.constant 0 : i32
    %c0_i32_0 = arith.constant 0 : i32
    %c0_i32_1 = arith.constant 0 : i32
    return %arg0, %c0_i32, %c0_i32_0 : i32, i32, i32
  }
}

</mosaic_0001>

<bundles_post_ra>
// kernel: squeeze.1
= control target key start
LH: loop header
LB: loop body
LE: loop exit
PB: predicated region body
PF: predicated region fallthrough
CT: control target
= control target key end

     0   :  { %vm16_vm0 = vcmask 130048   ;;  %s61_s0 = inlined_call_operand.vmem [shape: f32[16,3,3], index: 0, kind: input, shape index: {}]   ;;  %s62_s1 = inlined_call_operand.vmem [shape: f32[16,9], index: 1, kind: output, shape index: {}]  }
   0x1   :  { %v29_v0 = vld [vmem:[%s61_s0 + $0x8] sm:$0xf]  ;;  %v30_v1 = vld [vmem:[%s61_s0 + $0x4] sm:$0xf]  ;;  %v13_v2 = vld [vmem:[%s61_s0] sm:$0xf] }
   0x2   :  { %8 = vst [vmem:[#allocation0 + $0x10] sm:$0xf] %v29_v0  ;;  %12 = vst [vmem:[#allocation0 + $0x8] sm:$0xf] %v30_v1 }
   0x3   :  { %14 = vst [vmem:[#allocation0] sm:$0xf] %v13_v2 }
   0x9   :  { %v19_v4 = vld [vmem:[#allocation0 + $0x8] sm:$0x7]   ;;  %v24_v5 = vld [vmem:[#allocation0 + $0x10] sm:$0x7]  }
   0xa   :  { %v15_v3 = vld [vmem:[#allocation0] sm:$0x7]   ;;  %31 = vst.msk [vmem:[%s62_s1 + $0x3] sm:$0x7] %vm16_vm0, %v19_v4   ;;  %32 = vst.msk [vmem:[%s62_s1 + $0x6] sm:$0x7] %vm16_vm0, %v24_v5  }
   0xb   :  { %17 = vst.msk [vmem:[%s62_s1] sm:$0x7] %vm16_vm0, %v15_v3  }

// kernel: dwconv_forward.1
= control target key start
LH: loop header
LB: loop body
LE: loop exit
PB: predicated region body
PF: predicated region fallthrough
CT: control target
= control target key end

     0   :  { %v1063_v0 = vmov 3   ;;  %v1064_v2 = vmov 0   ;;  %v1065_v4 = vmov 6   ;;  %v1066_v5 = vmov 4   ;;  %s1072_s16 = smov 112   ;;  %s1075_s29 = smov 17   ;;  %s1711_s1 = inlined_call_operand.vmem [shape: f32[16,10], index: 1, kind: input, shape index: {}]   ;;  %s1712_s0 = inlined_call_operand.vmem [shape: f32[2,16,256], index: 0, kind: input, shape index: {}]   ;;  %s1713_s2 = inlined_call_operand.vmem [shape: f32[2,16,256], index: 2, kind: output, shape index: {}]  }
   0x1   :  { %1015 = vset.pattern.permute.xlu1 %v1063_v0  ;;  %v1096_v1 = vld [vmem:[%s1711_s1] sm:$0xff]  ;;  %1014 = vset.pattern.permute.xlu0 %v1064_v2  ;;  %v1103_v3 = vld [vmem:[%s1711_s1 + $0x8] sm:$0xff]  ;;  %v1067_v6 = vmov 5   ;;  %v1068_v7 = vmov 7   ;;  %v1069_v8 = vmov 8   ;;  %v1070_v9 = vmov 1  }
   0x2   :  { %111 = vperm.xlu1 %1015, %v1096_v1   ;;  %78 = vperm.xlu0 %1014, %v1096_v1   ;;  %v1071_v10 = vmov 2   ;;  %v1124_v11 = vld [vmem:[%s1712_s0] sm:$0xff]  ;;  %v1130_v15 = vld [vmem:[%s1712_s0 + $0x8] sm:$0xff]  ;;  %v1073_v17 = vmov 9   ;;  %v1138_v20 = vld [vmem:[%s1712_s0 + $0x10] sm:$0xff]  ;;  %vm166_vm0 = vcmask 916480  }
   0x3   :  { %v1143_v21 = vld [vmem:[%s1712_s0 + $0x18] sm:$0xff]  ;;  %v1154_v25 = vld [vmem:[%s1712_s0 + $0x20] sm:$0xff]  ;;  %v1162_v27 = vld [vmem:[%s1712_s0 + $0x28] sm:$0xff]  ;;  %vm267_vm1 = vcmask 785408   ;;  %s1076_s30 = smov 16   ;;  %s1077_s3 = smov 15  }
   0x4   :  { %v1172_v30 = vld [vmem:[%s1712_s0 + $0x30] sm:$0xff]  ;;  %v1177_v31 = vld [vmem:[%s1712_s0 + $0x38] sm:$0xff]  ;;  %s1074_s0 = smov 96   ;;  %vm342_vm2 = vcmask 138240   ;;  %vm599_vm3 = vcmask 130048   ;;  %vm874_vm6 = vcmask 121856  }
   0x6   :  { %115 = vperm.xlu1 %1015, %v1103_v3   ;;  %83 = vperm.xlu0 %1014, %v1103_v3  }
   0xa   :  { %1016 = vset.pattern.permute.xlu0 %v1065_v4  ;;  %1017 = vset.pattern.permute.xlu1 %v1065_v4 }
   0xb   :  { %212 = vperm.xlu0 %1016, %v1096_v1   ;;  %216 = vperm.xlu1 %1017, %v1103_v3  }
   0xf   :  { %1019 = vset.pattern.permute.xlu1 %v1066_v5  ;;  %1018 = vset.pattern.permute.xlu0 %v1066_v5 }
  0x10   :  { %412 = vperm.xlu1 %1019, %v1103_v3   ;;  %408 = vperm.xlu0 %1018, %v1096_v1  }
  0x14   :  { %1020 = vset.pattern.permute.xlu1 %v1067_v6  ;;  %1021 = vset.pattern.permute.xlu0 %v1067_v6 }
  0x15   :  { %657 = vperm.xlu1 %1020, %v1096_v1   ;;  %661 = vperm.xlu0 %1021, %v1103_v3  }
  0x19   :  { %1022 = vset.pattern.permute.xlu1 %v1068_v7  ;;  %1023 = vset.pattern.permute.xlu0 %v1069_v8 }
  0x1a   :  { %476 = vperm.xlu1 %1022, %v1096_v1   ;;  %745 = vperm.xlu0 %1023, %v1096_v1  }
  0x1e   :  { %480 = vperm.xlu1 %1022, %v1103_v3   ;;  %1025 = vset.pattern.permute.xlu0 %v1070_v9 }
  0x1f   :  { %376 = vperm.xlu0 %1025, %v1096_v1  }
  0x22   :  { %1024 = vset.pattern.permute.xlu1 %v1069_v8 }
  0x23   :  { %749 = vperm.xlu1 %1024, %v1103_v3   ;;  %1028 = vset.pattern.permute.xlu0 %v1071_v10 }
  0x24   :  { %629 = vperm.xlu0 %1028, %v1103_v3  }
  0x27   :  { %1026 = vset.pattern.permute.xlu1 %v1070_v9 }
  0x28   :  { %380 = vperm.xlu1 %1026, %v1103_v3   ;;  %1029 = vset.pattern.permute.xlu0 %v1073_v17 }
  0x2c   :  { %1027 = vset.pattern.permute.xlu1 %v1071_v10 }
  0x2d   :  { %625 = vperm.xlu1 %1027, %v1096_v1  }
  0x31   :  { %1030 = vset.pattern.permute.xlu1 %v1073_v17 }
  0x81   :  { %v112_v12 = vpop.permute.xlu1 %111  ;;  %v1149_v24 = vpop.permute.xlu0 %78 }
  0x82   :  { %v118_v13 = vmul.f32 0.0, %v112_v12  ;;  %v119_v14 = vmul.f32 %v112_v12, %v1124_v11  ;;  %v120_v18 = vmul.f32 %v112_v12, %v1130_v15  ;;  %v125_v26 = vmul.f32 %v112_v12, %v1154_v25 }
  0x83   :  { %v126_v29 = vmul.f32 %v112_v12, %v1162_v27 }
  0x84   :  { %142 = vrot.lane.b32.xlu0 %v118_v13, %s1072_s16  ;;  %144 = vrot.lane.b32.xlu1 %v119_v14, %s1072_s16 }
  0x85   :  { %v116_v16 = vpop.permute.xlu1 %115  ;;  %v1166_v28 = vpop.permute.xlu0 %83 }
  0x86   :  { %v121_v19 = vmul.f32 0.0, %v116_v16  ;;  %v122_v22 = vmul.f32 %v116_v16, %v1138_v20  ;;  %v123_v23 = vmul.f32 %v116_v16, %v1143_v21  ;;  %v128_v33 = vmul.f32 %v116_v16, %v1172_v30 }
  0x87   :  { %v129_v34 = vmul.f32 %v116_v16, %v1177_v31 }
  0x88   :  { %146 = vrot.lane.b32.xlu0 %v120_v18, %s1072_s16  ;;  %148 = vrot.lane.b32.xlu1 %v121_v19, %s1072_s16 }
  0x8a   :  { %v213_v32 = vpop.permute.xlu0 %212  ;;  %v217_v37 = vpop.permute.xlu1 %216 }
  0x8b   :  { %v220_v35 = vmul.f32 %v213_v32, %v1130_v15  ;;  %v219_v36 = vmul.f32 %v213_v32, %v1124_v11  ;;  %v222_v38 = vmul.f32 %v217_v37, %v1138_v20  ;;  %v221_v39 = vmul.f32 0.0, %v213_v32 }
  0x8c   :  { %150 = vrot.lane.b32.xlu0 %v122_v22, %s1072_s16  ;;  %152 = vrot.lane.b32.xlu1 %v123_v23, %s1072_s16  ;;  %v224_v40 = vmul.f32 0.0, %v217_v37  ;;  %v223_v41 = vmul.f32 %v217_v37, %v1143_v21  ;;  %v226_v42 = vmul.f32 %v213_v32, %v1162_v27  ;;  %v225_v43 = vmul.f32 %v213_v32, %v1154_v25 }
  0x8d   :  { %v229_v45 = vmul.f32 %v217_v37, %v1177_v31  ;;  %v228_v48 = vmul.f32 %v217_v37, %v1172_v30 }
  0x8f   :  { %v413_v44 = vpop.permute.xlu1 %412  ;;  %v409_v47 = vpop.permute.xlu0 %408 }
  0x90   :  { %154 = vrot.lane.b32.xlu0 %v118_v13, %s1072_s16  ;;  %156 = vrot.lane.b32.xlu1 %v125_v26, %s1072_s16  ;;  %v417_v46 = vmul.f32 %v413_v44, %v1138_v20  ;;  %v419_v49 = vmul.f32 %v409_v47, %v1154_v25  ;;  %v415_v50 = vmul.f32 %v409_v47, %v1124_v11 }
  0x91   :  { %v421_v52 = vmul.f32 %v413_v44, %v1172_v30  ;;  %v416_v54 = vmul.f32 %v409_v47, %v1130_v15  ;;  %v418_v57 = vmul.f32 %v413_v44, %v1143_v21  ;;  %v420_v59 = vmul.f32 %v409_v47, %v1162_v27 }
  0x92   :  { %v422_v61 = vmul.f32 %v413_v44, %v1177_v31  ;;  %v90_v44 = vmul.f32 %v1166_v28, %v1138_v20 }
  0x94   :  { %158 = vrot.lane.b32.xlu0 %v126_v29, %s1072_s16  ;;  %160 = vrot.lane.b32.xlu1 %v121_v19, %s1072_s16  ;;  %v658_v51 = vpop.permute.xlu1 %657  ;;  %v662_v56 = vpop.permute.xlu0 %661 }
  0x95   :  { %v664_v53 = vmul.f32 %v658_v51, %v1124_v11  ;;  %v666_v55 = vmul.f32 0.0, %v658_v51  ;;  %v668_v58 = vmul.f32 %v662_v56, %v1143_v21  ;;  %v670_v60 = vmul.f32 %v658_v51, %v1154_v25 }
  0x96   :  { %v665_v62 = vmul.f32 %v658_v51, %v1130_v15  ;;  %v674_v0 = vmul.f32 %v662_v56, %v1177_v31  ;;  %v667_v2 = vmul.f32 %v662_v56, %v1138_v20  ;;  %v669_v5 = vmul.f32 0.0, %v662_v56 }
  0x97   :  { %v671_v7 = vmul.f32 %v658_v51, %v1162_v27  ;;  %v673_v10 = vmul.f32 %v662_v56, %v1172_v30 }
  0x98   :  { %162 = vrot.lane.b32.xlu0 %v128_v33, %s1072_s16  ;;  %164 = vrot.lane.b32.xlu1 %v129_v34, %s1072_s16 }
  0x99   :  { %v477_v63 = vpop.permute.xlu1 %476  ;;  %v746_v16 = vpop.permute.xlu0 %745 }
  0x9a   :  { %v483_v4 = vmul.f32 %v477_v63, %v1124_v11  ;;  %v485_v6 = vmul.f32 0.0, %v477_v63  ;;  %v489_v12 = vmul.f32 %v477_v63, %v1154_v25  ;;  %v484_v13 = vmul.f32 %v477_v63, %v1130_v15 }
  0x9b   :  { %v752_v19 = vmul.f32 %v746_v16, %v1124_v11  ;;  %v754_v29 = vmul.f32 0.0, %v746_v16  ;;  %v490_v32 = vmul.f32 %v477_v63, %v1162_v27  ;;  %v759_v56 = vmul.f32 %v746_v16, %v1162_v27 }
  0x9c   :  { %245 = vrot.lane.b32.xlu0 %v220_v35, %s1074_s0  ;;  %243 = vrot.lane.b32.xlu1 %v219_v36, %s1074_s0 }
  0x9d   :  { %v481_v8 = vpop.permute.xlu1 %480 }
  0x9e   :  { %v487_v9 = vmul.f32 %v481_v8, %v1143_v21  ;;  %v493_v17 = vmul.f32 %v481_v8, %v1177_v31  ;;  %v486_v18 = vmul.f32 %v481_v8, %v1138_v20  ;;  %v488_v22 = vmul.f32 0.0, %v481_v8  ;;  %v1258_v26 = vpop.permute.xlu0 %376 }
  0x9f   :  { %v492_v36 = vmul.f32 %v481_v8, %v1172_v30  ;;  %v89_v8 = vmul.f32 0.0, %v1166_v28 }
  0xa0   :  { %249 = vrot.lane.b32.xlu0 %v222_v38, %s1074_s0  ;;  %247 = vrot.lane.b32.xlu1 %v221_v39, %s1074_s0 }
  0xa2   :  { %v750_v14 = vpop.permute.xlu1 %749 }
  0xa3   :  { %v1267_v34 = vpop.permute.xlu0 %629  ;;  %v756_v35 = vmul.f32 %v750_v14, %v1143_v21  ;;  %v755_v47 = vmul.f32 %v750_v14, %v1138_v20 }
  0xa4   :  { %253 = vrot.lane.b32.xlu0 %v224_v40, %s1074_s0  ;;  %251 = vrot.lane.b32.xlu1 %v223_v41, %s1074_s0 }
  0xa7   :  { %v1256_v23 = vpop.permute.xlu1 %380 }
  0xa8   :  { %257 = vrot.lane.b32.xlu0 %v226_v42, %s1074_s0  ;;  %255 = vrot.lane.b32.xlu1 %v225_v43, %s1074_s0  ;;  %v753_v42 = vmul.f32 %v746_v16, %v1130_v15 }
  0xac   :  { %263 = vrot.lane.b32.xlu0 %v229_v45, %s1074_s0  ;;  %259 = vrot.lane.b32.xlu1 %v221_v39, %s1074_s0  ;;  %v1265_v33 = vpop.permute.xlu1 %625  ;;  %v758_v39 = vmul.f32 %v746_v16, %v1154_v25 }
  0xb0   :  { %435 = vrot.lane.b32.xlu0 %v417_v46, %s1072_s16  ;;  %261 = vrot.lane.b32.xlu1 %v228_v48, %s1074_s0  ;;  %v762_v46 = vmul.f32 %v750_v14, %v1177_v31 }
  0xb4   :  { %439 = vrot.lane.b32.xlu0 %v419_v49, %s1072_s16  ;;  %265 = vrot.lane.b32.xlu1 %v224_v40, %s1074_s0 }
  0xb8   :  { %443 = vrot.lane.b32.xlu0 %v421_v52, %s1072_s16  ;;  %431 = vrot.lane.b32.xlu1 %v415_v50, %s1072_s16  ;;  %v757_v52 = vmul.f32 0.0, %v750_v14 }
  0xbc   :  { %688 = vrot.lane.b32.xlu0 %v664_v53, %s1072_s16  ;;  %433 = vrot.lane.b32.xlu1 %v416_v54, %s1072_s16  ;;  %v93_v53 = vmul.f32 %v1149_v24, %v1154_v25 }
  0xc0   :  { %692 = vrot.lane.b32.xlu0 %v666_v55, %s1072_s16  ;;  %437 = vrot.lane.b32.xlu1 %v418_v57, %s1072_s16 }
  0xc4   :  { %696 = vrot.lane.b32.xlu0 %v668_v58, %s1072_s16  ;;  %441 = vrot.lane.b32.xlu1 %v420_v59, %s1072_s16 }
  0xc8   :  { %700 = vrot.lane.b32.xlu0 %v670_v60, %s1072_s16  ;;  %445 = vrot.lane.b32.xlu1 %v422_v61, %s1072_s16  ;;  %v96_v60 = vmul.f32 %v1166_v28, %v1172_v30 }
  0xcc   :  { %704 = vrot.lane.b32.xlu0 %v666_v55, %s1072_s16  ;;  %690 = vrot.lane.b32.xlu1 %v665_v62, %s1072_s16  ;;  %v761_v62 = vmul.f32 %v750_v14, %v1172_v30 }
  0xd0   :  { %708 = vrot.lane.b32.xlu0 %v674_v0, %s1072_s16  ;;  %694 = vrot.lane.b32.xlu1 %v667_v2, %s1072_s16  ;;  %v87_v0 = vmul.f32 %v1149_v24, %v1124_v11 }
  0xd4   :  { %507 = vrot.lane.b32.xlu0 %v483_v4, %s1074_s0  ;;  %698 = vrot.lane.b32.xlu1 %v669_v5, %s1072_s16 }
  0xd8   :  { %511 = vrot.lane.b32.xlu0 %v485_v6, %s1074_s0  ;;  %702 = vrot.lane.b32.xlu1 %v671_v7, %s1072_s16 }
  0xdc   :  { %515 = vrot.lane.b32.xlu0 %v487_v9, %s1074_s0  ;;  %706 = vrot.lane.b32.xlu1 %v673_v10, %s1072_s16  ;;  %v88_v10 = vmul.f32 %v1149_v24, %v1130_v15 }
  0xe0   :  { %519 = vrot.lane.b32.xlu0 %v489_v12, %s1074_s0  ;;  %710 = vrot.lane.b32.xlu1 %v669_v5, %s1072_s16 }
  0xe4   :  { %523 = vrot.lane.b32.xlu0 %v485_v6, %s1074_s0  ;;  %509 = vrot.lane.b32.xlu1 %v484_v13, %s1074_s0 }
  0xe8   :  { %527 = vrot.lane.b32.xlu0 %v493_v17, %s1074_s0  ;;  %513 = vrot.lane.b32.xlu1 %v486_v18, %s1074_s0 }
  0xec   :  { %776 = vrot.lane.b32.xlu0 %v752_v19, %s1074_s0  ;;  %517 = vrot.lane.b32.xlu1 %v488_v22, %s1074_s0 }
  0xf0   :  { %780 = vrot.lane.b32.xlu0 %v754_v29, %s1074_s0  ;;  %521 = vrot.lane.b32.xlu1 %v490_v32, %s1074_s0 }
  0xf4   :  { %784 = vrot.lane.b32.xlu0 %v756_v35, %s1074_s0  ;;  %525 = vrot.lane.b32.xlu1 %v492_v36, %s1074_s0 }
  0xf6   :  { %v1273_v37 = vpop.permute.xlu0 %142  ;;  %v1275_v38 = vpop.permute.xlu1 %144 }
  0xf8   :  { %788 = vrot.lane.b32.xlu0 %v758_v39, %s1074_s0  ;;  %529 = vrot.lane.b32.xlu1 %v488_v22, %s1074_s0  ;;  %v91_v22 = vmul.f32 %v1166_v28, %v1143_v21 }
  0xfa   :  { %v147_v40 = vpop.permute.xlu0 %146  ;;  %v149_v41 = vpop.permute.xlu1 %148 }
  0xfb   :  { %v189_v14 = vadd.f32 %v147_v40, %v88_v10 }
  0xfc   :  { %792 = vrot.lane.b32.xlu0 %v754_v29, %s1074_s0  ;;  %778 = vrot.lane.b32.xlu1 %v753_v42, %s1074_s0 }
  0xfe   :  { %v151_v43 = vpop.permute.xlu0 %150  ;;  %v153_v45 = vpop.permute.xlu1 %152 }
  0xff   :  { %v170_v48 = vsel %vm166_vm0, %v151_v43, %v153_v45  ;;  %v169_v5 = vsel %vm166_vm0, %v149_v41, %v151_v43  ;;  %v192_v32 = vadd.f32 %v153_v45, %v91_v22 }
 0x100   :  { %v191_v49 = vadd.f32 %v170_v48, %v90_v44  ;;  %796 = vrot.lane.b32.xlu0 %v762_v46, %s1074_s0  ;;  %782 = vrot.lane.b32.xlu1 %v755_v47, %s1074_s0  ;;  %v190_v13 = vadd.f32 %v169_v5, %v89_v8 }
 0x102   :  { %v155_v50 = vpop.permute.xlu0 %154  ;;  %v157_v51 = vpop.permute.xlu1 %156 }
 0x103   :  { %v171_v35 = vsel %vm166_vm0, %v155_v50, %v157_v51  ;;  %v94_v50 = vmul.f32 %v1149_v24, %v1162_v27 }
 0x104   :  { %786 = vrot.lane.b32.xlu1 %v757_v52, %s1074_s0  ;;  %908 = vperm.xlu0 %1029, %v1096_v1   ;;  %v168_v1 = vsel %vm166_vm0, %v1275_v38, %v147_v40  ;;  %v1326_v40 = vmul.f32 0.0, %v1149_v24  ;;  %v97_v24 = vmul.f32 %v1166_v28, %v1177_v31 }
 0x105   :  { %v188_v4 = vadd.f32 %v168_v1, %v87_v0 }
 0x106   :  { %v159_v54 = vpop.permute.xlu0 %158  ;;  %v161_v55 = vpop.permute.xlu1 %160 }
 0x107   :  { %v172_v57 = vsel %vm166_vm0, %v157_v51, %v159_v54 }
 0x108   :  { %v194_v58 = vadd.f32 %v172_v57, %v93_v53  ;;  %790 = vrot.lane.b32.xlu1 %v759_v56, %s1074_s0 }
 0x10a   :  { %v163_v59 = vpop.permute.xlu0 %162  ;;  %v165_v61 = vpop.permute.xlu1 %164 }
 0x10b   :  { %v174_v63 = vsel %vm166_vm0, %v163_v59, %v165_v61 }
 0x10c   :  { %v197_v2 = vadd.f32 %v174_v63, %v96_v60  ;;  %794 = vrot.lane.b32.xlu1 %v761_v62, %s1074_s0 }
 0x10e   :  { %v246_v6 = vpop.permute.xlu0 %245  ;;  %v1307_v7 = vpop.permute.xlu1 %243 }
 0x10f   :  { %v268_v9 = vsel %vm267_vm1, %v1307_v7, %v246_v6 }
 0x110   :  { %v1314_v12 = vadd.f32 %v268_v9, %v188_v4  ;;  %798 = vrot.lane.b32.xlu1 %v757_v52, %s1074_s0  ;;  %v195_v52 = vadd.f32 %v159_v54, %v94_v50  ;;  %v634_v50 = vmul.f32 %v1265_v33, %v1130_v15 }
 0x112   :  { %v250_v16 = vpop.permute.xlu0 %249  ;;  %v248_v17 = vpop.permute.xlu1 %247 }
 0x113   :  { %v1317_v18 = vadd.f32 %v250_v16, %v190_v13  ;;  %v269_v19 = vsel %vm267_vm1, %v246_v6, %v248_v17  ;;  %v384_v13 = vmul.f32 %v1258_v26, %v1124_v11 }
 0x114   :  { %v290_v29 = vadd.f32 %v269_v19, %v189_v14  ;;  %912 = vperm.xlu1 %1030, %v1103_v3   ;;  %v193_v3 = vadd.f32 %v171_v35, %v1326_v40 }
 0x116   :  { %v254_v36 = vpop.permute.xlu0 %253  ;;  %322 = vrot.lane.b32.xlu0 %v290_v29, %s1075_s29  ;;  %v252_v39 = vpop.permute.xlu1 %251 }
 0x117   :  { %v270_v41 = vsel %vm267_vm1, %v250_v16, %v252_v39  ;;  %v271_v42 = vsel %vm267_vm1, %v252_v39, %v254_v36  ;;  %v387_v16 = vmul.f32 %v1256_v23, %v1138_v20 }
 0x118   :  { %v1330_v43 = vadd.f32 %v270_v41, %v191_v49  ;;  %v293_v44 = vadd.f32 %v271_v42, %v192_v32  ;;  %v173_v49 = vsel %vm166_vm0, %v161_v55, %v163_v59  ;;  %v198_v55 = vadd.f32 %v165_v61, %v97_v24 }
 0x119   :  { %v196_v62 = vadd.f32 %v173_v49, %v89_v8  ;;  %v390_v32 = vmul.f32 %v1258_v26, %v1154_v25  ;;  %v393_v42 = vmul.f32 %v1256_v23, %v1172_v30 }
 0x11a   :  { %v258_v45 = vpop.permute.xlu0 %257  ;;  %328 = vrot.lane.b32.xlu1 %v293_v44, %s1075_s29  ;;  %v256_v46 = vpop.permute.xlu1 %255 }
 0x11b   :  { %v272_v47 = vsel %vm267_vm1, %v256_v46, %v258_v45  ;;  %v1335_v48 = vadd.f32 %v256_v46, %v193_v3 }
 0x11c   :  { %v1339_v51 = vadd.f32 %v272_v47, %v194_v58  ;;  %v633_v47 = vmul.f32 %v1265_v33, %v1124_v11  ;;  %v383_v11 = vmul.f32 0.0, %v1258_v26 }
 0x11e   :  { %v264_v53 = vpop.permute.xlu0 %263  ;;  %v260_v56 = vpop.permute.xlu1 %259 }
 0x11f   :  { %v273_v57 = vsel %vm267_vm1, %v258_v45, %v260_v56 }
 0x120   :  { %v296_v60 = vadd.f32 %v273_v57, %v195_v52 }
 0x122   :  { %v1343_v1 = vpop.permute.xlu0 %435  ;;  %334 = vrot.lane.b32.xlu0 %v296_v60, %s1075_s29  ;;  %v262_v63 = vpop.permute.xlu1 %261 }
 0x123   :  { %v274_v0 = vsel %vm267_vm1, %v262_v63, %v264_v53  ;;  %v1347_v4 = vadd.f32 %v262_v63, %v196_v62  ;;  %v636_v62 = vmul.f32 %v1267_v34, %v1138_v20 }
 0x124   :  { %v1351_v54 = vadd.f32 %v274_v0, %v197_v2 }
 0x126   :  { %v1353_v58 = vpop.permute.xlu0 %439  ;;  %v266_v59 = vpop.permute.xlu1 %265 }
 0x127   :  { %v275_v5 = vsel %vm267_vm1, %v264_v53, %v266_v59 }
 0x128   :  { %v299_v6 = vadd.f32 %v275_v5, %v198_v55  ;;  %v637_v5 = vmul.f32 %v1267_v34, %v1143_v21 }
 0x12a   :  { %v1356_v8 = vpop.permute.xlu0 %443  ;;  %340 = vrot.lane.b32.xlu0 %v299_v6, %s1075_s29  ;;  %v432_v9 = vpop.permute.xlu1 %431 }
 0x12b   :  { %v463_v55 = vadd.f32 %v432_v9, %v383_v11 }
 0x12e   :  { %v1359_v10 = vpop.permute.xlu0 %688  ;;  %v434_v28 = vpop.permute.xlu1 %433 }
 0x12f   :  { %v447_v2 = vsel %vm166_vm0, %v432_v9, %v434_v28  ;;  %v640_v9 = vmul.f32 %v1265_v33, %v1162_v27 }
 0x130   :  { %v1364_v61 = vadd.f32 %v447_v2, %v384_v13 }
 0x132   :  { %v693_v14 = vpop.permute.xlu0 %692  ;;  %v1368_v17 = vpop.permute.xlu1 %437 }
 0x133   :  { %v448_v19 = vsel %vm166_vm0, %v1343_v1, %v1368_v17 }
 0x134   :  { %v1373_v22 = vadd.f32 %v448_v19, %v387_v16  ;;  %v639_v16 = vmul.f32 %v1265_v33, %v1154_v25 }
 0x136   :  { %v697_v29 = vpop.permute.xlu0 %696  ;;  %v1377_v35 = vpop.permute.xlu1 %441 }
 0x137   :  { %v449_v36 = vsel %vm166_vm0, %v1353_v58, %v1377_v35 }
 0x138   :  { %v1382_v39 = vadd.f32 %v449_v36, %v390_v32 }
 0x13a   :  { %v1384_v41 = vpop.permute.xlu0 %700  ;;  %v1388_v44 = vpop.permute.xlu1 %445 }
 0x13b   :  { %v450_v3 = vsel %vm166_vm0, %v1356_v8, %v1388_v44 }
 0x13c   :  { %v1393_v45 = vadd.f32 %v450_v3, %v393_v42 }
 0x13e   :  { %v705_v46 = vpop.permute.xlu0 %704  ;;  %v691_v52 = vpop.permute.xlu1 %690 }
 0x13f   :  { %v712_v49 = vsel %vm166_vm0, %v1359_v10, %v691_v52  ;;  %v713_v53 = vsel %vm166_vm0, %v691_v52, %v693_v14 }
 0x140   :  { %v1402_v56 = vadd.f32 %v712_v49, %v633_v47  ;;  %v1404_v57 = vadd.f32 %v713_v53, %v634_v50  ;;  %v642_v47 = vmul.f32 %v1267_v34, %v1172_v30 }
 0x142   :  { %v709_v60 = vpop.permute.xlu0 %708  ;;  %v1408_v63 = vpop.permute.xlu1 %694 }
 0x143   :  { %v714_v0 = vsel %vm166_vm0, %v1408_v63, %v697_v29 }
 0x144   :  { %v1413_v24 = vadd.f32 %v714_v0, %v636_v62  ;;  %v385_v0 = vmul.f32 %v1258_v26, %v1130_v15 }
 0x146   :  { %v1415_v59 = vpop.permute.xlu0 %507  ;;  %v699_v6 = vpop.permute.xlu1 %698  ;;  %v465_v30 = vadd.f32 %v434_v28, %v385_v0  ;;  %v388_v28 = vmul.f32 %v1256_v23, %v1143_v21 }
 0x147   :  { %v551_v13 = vadd.f32 %v1415_v59, %v463_v55  ;;  %v715_v20 = vsel %vm166_vm0, %v697_v29, %v699_v6 }
 0x148   :  { %v1421_v2 = vadd.f32 %v715_v20, %v637_v5 }
 0x149   :  { %575 = vrot.lane.b32.xlu1 %v551_v13, %s1076_s30  ;;  %v386_v13 = vmul.f32 0.0, %v1256_v23 }
 0x14a   :  { %v512_v14 = vpop.permute.xlu0 %511  ;;  %v703_v19 = vpop.permute.xlu1 %702 }
 0x14b   :  { %v716_v32 = vsel %vm166_vm0, %v1384_v41, %v703_v19  ;;  %v717_v36 = vsel %vm166_vm0, %v703_v19, %v705_v46  ;;  %v643_v46 = vmul.f32 %v1267_v34, %v1177_v31  ;;  %v469_v19 = vadd.f32 %v1353_v58, %v383_v11 }
 0x14c   :  { %v1431_v42 = vadd.f32 %v716_v32, %v639_v16  ;;  %v1433_v29 = vadd.f32 %v717_v36, %v640_v9  ;;  %v466_v9 = vadd.f32 %v1343_v1, %v386_v13  ;;  %v391_v11 = vmul.f32 %v1258_v26, %v1162_v27 }
 0x14e   :  { %v1435_v3 = vpop.permute.xlu0 %515  ;;  %v1439_v50 = vpop.permute.xlu1 %706 }
 0x14f   :  { %v718_v25 = vsel %vm166_vm0, %v1439_v50, %v709_v60 }
 0x150   :  { %v1443_v52 = vadd.f32 %v718_v25, %v642_v47 }
 0x152   :  { %v1445_v49 = vpop.permute.xlu0 %519  ;;  %v711_v53 = vpop.permute.xlu1 %710 }
 0x153   :  { %v719_v62 = vsel %vm166_vm0, %v709_v60, %v711_v53  ;;  %v557_v36 = vadd.f32 %v1445_v49, %v469_v19 }
 0x154   :  { %v1452_v55 = vadd.f32 %v719_v62, %v643_v46  ;;  %v471_v46 = vadd.f32 %v1377_v35, %v391_v11  ;;  %v394_v35 = vmul.f32 %v1256_v23, %v1177_v31  ;;  %v635_v23 = vmul.f32 0.0, %v1267_v34 }
 0x156   :  { %v524_v5 = vpop.permute.xlu0 %523  ;;  %v1454_v6 = vpop.permute.xlu1 %509 }
 0x157   :  { %v532_v20 = vsel %vm267_vm1, %v1454_v6, %v512_v14  ;;  %v468_v14 = vadd.f32 %v1368_v17, %v388_v28  ;;  %v632_v17 = vmul.f32 0.0, %v1265_v33  ;;  %v474_v33 = vadd.f32 %v1388_v44, %v394_v35 }
 0x158   :  { %v553_v16 = vadd.f32 %v532_v20, %v465_v30  ;;  %v472_v30 = vadd.f32 %v1356_v8, %v386_v13  ;;  %v167_v44 = vsel %vm166_vm0, %v1273_v37, %v1275_v38  ;;  %v531_v37 = vsel %vm267_vm1, %v1415_v59, %v1454_v6 }
 0x159   :  { %v732_v20 = vadd.f32 %v1359_v10, %v632_v17  ;;  %v738_v19 = vadd.f32 %v1384_v41, %v632_v17  ;;  %v735_v41 = vadd.f32 %v1408_v63, %v635_v23 }
 0x15a   :  { %v1461_v60 = vpop.permute.xlu0 %527  ;;  %579 = vrot.lane.b32.xlu1 %v553_v16, %s1076_s30  ;;  %v514_v15 = vpop.permute.xlu1 %513 }
 0x15b   :  { %v554_v32 = vadd.f32 %v514_v15, %v466_v9  ;;  %v533_v38 = vsel %vm267_vm1, %v514_v15, %v1435_v3 }
 0x15d   :  { %581 = vrot.lane.b32.xlu0 %v554_v32, %s1076_s30 }
 0x15e   :  { %v777_v47 = vpop.permute.xlu0 %776  ;;  %587 = vrot.lane.b32.xlu1 %v557_v36, %s1076_s30  ;;  %v518_v1 = vpop.permute.xlu1 %517 }
 0x15f   :  { %v534_v58 = vsel %vm267_vm1, %v1435_v3, %v518_v1  ;;  %v820_v9 = vadd.f32 %v777_v47, %v732_v20  ;;  %v741_v1 = vadd.f32 %v1439_v50, %v635_v23 }
 0x160   :  { %v556_v25 = vadd.f32 %v534_v58, %v468_v14  ;;  %v187_v14 = vadd.f32 %v167_v44, %v1326_v40 }
 0x162   :  { %v781_v21 = vpop.permute.xlu0 %780  ;;  %585 = vrot.lane.b32.xlu0 %v556_v25, %s1076_s30  ;;  %v522_v53 = vpop.permute.xlu1 %521  ;;  %v288_v34 = vadd.f32 %v1307_v7, %v187_v14  ;;  %v552_v7 = vadd.f32 %v531_v37, %v1364_v61 }
 0x163   :  { %v536_v62 = vsel %vm267_vm1, %v522_v53, %v524_v5  ;;  %v535_v40 = vsel %vm267_vm1, %v1445_v49, %v522_v53 }
 0x164   :  { %v559_v0 = vadd.f32 %v536_v62, %v471_v46 }
 0x166   :  { %v785_v16 = vpop.permute.xlu0 %784  ;;  %591 = vrot.lane.b32.xlu1 %v559_v0, %s1076_s30  ;;  %v526_v27 = vpop.permute.xlu1 %525 }
 0x167   :  { %v560_v26 = vadd.f32 %v526_v27, %v472_v30 }
 0x169   :  { %593 = vrot.lane.b32.xlu0 %v560_v26, %s1076_s30 }
 0x16a   :  { %v789_v5 = vpop.permute.xlu0 %788  ;;  %850 = vrot.lane.b32.xlu1 %v820_v9, %s1077_s3  ;;  %v530_v8 = vpop.permute.xlu1 %529 }
 0x16b   :  { %v826_v10 = vadd.f32 %v789_v5, %v738_v19  ;;  %v538_v13 = vsel %vm267_vm1, %v1461_v60, %v530_v8  ;;  %v37_v8 = vlaneseq }
 0x16c   :  { %v562_v32 = vadd.f32 %v538_v13, %v474_v33 }
 0x16e   :  { %862 = vrot.lane.b32.xlu1 %v826_v10, %s1077_s3  ;;  %597 = vrot.lane.b32.xlu0 %v562_v32, %s1076_s30  ;;  %v779_v31 = vpop.permute.xlu1 %778  ;;  %v38_v32 = vand.u32 127, %v37_v8 }
 0x170   :  { %v44_v14 = vand.u32 15, %v38_v32 }
 0x172   :  { %v783_v28 = vpop.permute.xlu1 %782  ;;  %320 = vrot.lane.b32.xlu1 %v1314_v12, %s1075_s29  ;;  %vm1580_vm5 = vcmp.ge.s32.totalorder %v44_v14, 1  ;;  %vm1589_vm7 = vcmp.lt.s32.totalorder %v44_v14, 15 }
 0x173   :  { %v823_v36 = vadd.f32 %v783_v28, %v735_v41  ;;  %v802_v3 = vsel %vm267_vm1, %v783_v28, %v785_v16  ;;  %v39_v41 = vadd.s32 128, %v38_v32 }
 0x174   :  { %v824_v6 = vadd.f32 %v802_v3, %v1413_v24 }
 0x175   :  { %856 = vrot.lane.b32.xlu0 %v823_v36, %s1077_s3  ;;  %v51_v36 = vand.u32 15, %v39_v41 }
 0x176   :  { %324 = vrot.lane.b32.xlu1 %v1317_v18, %s1075_s29  ;;  %v787_v12 = vpop.permute.xlu1 %786  ;;  %v555_v18 = vadd.f32 %v533_v38, %v1373_v22 }
 0x177   :  { %v803_v59 = vsel %vm267_vm1, %v785_v16, %v787_v12  ;;  %vm1575_vm4 = vcmp.ge.s32.totalorder %v51_v36, 1  ;;  %vm1593_vm8 = vcmp.lt.s32.totalorder %v51_v36, 15 }
 0x179   :  { %318 = vrot.lane.b32.xlu0 %v288_v34, %s1075_s29 }
 0x17a   :  { %332 = vrot.lane.b32.xlu1 %v1339_v51, %s1075_s29  ;;  %v791_v61 = vpop.permute.xlu1 %790 }
 0x17d   :  { %326 = vrot.lane.b32.xlu0 %v1330_v43, %s1075_s29  ;;  %v537_v43 = vsel %vm267_vm1, %v526_v27, %v1461_v60  ;;  %v804_v60 = vsel %vm267_vm1, %v789_v5, %v791_v61 }
 0x17e   :  { %336 = vrot.lane.b32.xlu1 %v1347_v4, %s1075_s29  ;;  %v561_v51 = vadd.f32 %v537_v43, %v1393_v45  ;;  %v800_v4 = vsel %vm267_vm1, %v777_v47, %v779_v31  ;;  %v825_v45 = vadd.f32 %v803_v59, %v1421_v2  ;;  %v795_v49 = vpop.permute.xlu1 %794 }
 0x17f   :  { %v821_v22 = vadd.f32 %v800_v4, %v1402_v56  ;;  %v829_v24 = vadd.f32 %v795_v49, %v741_v1 }
 0x181   :  { %330 = vrot.lane.b32.xlu0 %v1335_v48, %s1075_s29  ;;  %v558_v48 = vadd.f32 %v535_v40, %v1382_v39  ;;  %v793_v39 = vpop.permute.xlu0 %792 }
 0x182   :  { %338 = vrot.lane.b32.xlu1 %v1351_v54, %s1075_s29  ;;  %v801_v54 = vsel %vm267_vm1, %v779_v31, %v781_v21  ;;  %v805_v56 = vsel %vm267_vm1, %v791_v61, %v793_v39  ;;  %v799_v58 = vpop.permute.xlu1 %798 }
 0x183   :  { %v822_v63 = vadd.f32 %v801_v54, %v1404_v57  ;;  %v827_v57 = vadd.f32 %v804_v60, %v1431_v42  ;;  %v828_v47 = vadd.f32 %v805_v56, %v1433_v29 }
 0x185   :  { %577 = vrot.lane.b32.xlu0 %v552_v7, %s1076_s30  ;;  %v797_v15 = vpop.permute.xlu0 %796 }
 0x186   :  { %583 = vrot.lane.b32.xlu1 %v555_v18, %s1076_s30  ;;  %v806_v2 = vsel %vm267_vm1, %v795_v49, %v797_v15  ;;  %v807_v25 = vsel %vm267_vm1, %v797_v15, %v799_v58 }
 0x187   :  { %v830_v11 = vadd.f32 %v806_v2, %v1443_v52  ;;  %v831_v42 = vadd.f32 %v807_v25, %v1452_v55 }
 0x189   :  { %589 = vrot.lane.b32.xlu0 %v558_v48, %s1076_s30  ;;  %v1559_v50 = vpop.permute.xlu0 %908 }
 0x18a   :  { %595 = vrot.lane.b32.xlu1 %v561_v51, %s1076_s30 }
 0x18d   :  { %852 = vrot.lane.b32.xlu0 %v821_v22, %s1077_s3  ;;  %v323_v21 = vpop.permute.xlu0 %322 }
 0x18e   :  { %854 = vrot.lane.b32.xlu1 %v822_v63, %s1077_s3 }
 0x191   :  { %860 = vrot.lane.b32.xlu0 %v825_v45, %s1077_s3 }
 0x192   :  { %858 = vrot.lane.b32.xlu1 %v824_v6, %s1077_s3 }
 0x193   :  { %v1557_v29 = vpop.permute.xlu1 %912 }
 0x194   :  { %v335_v62 = vpop.permute.xlu0 %334 }
 0x195   :  { %864 = vrot.lane.b32.xlu0 %v827_v57, %s1077_s3 }
 0x196   :  { %866 = vrot.lane.b32.xlu1 %v828_v47, %s1077_s3 }
 0x197   :  { %v329_v46 = vpop.permute.xlu1 %328 }
 0x199   :  { %868 = vrot.lane.b32.xlu0 %v829_v24, %s1077_s3 }
 0x19a   :  { %870 = vrot.lane.b32.xlu1 %v830_v11, %s1077_s3 }
 0x19c   :  { %v1561_v52 = vpop.permute.xlu0 %340 }
 0x19d   :  { %872 = vrot.lane.b32.xlu0 %v831_v42, %s1077_s3 }
 0x1bb   :  { %v576_v53 = vpop.permute.xlu1 %575 }
 0x1cc   :  { %v580_v17 = vpop.permute.xlu1 %579 }
 0x1cf   :  { %v582_v0 = vpop.permute.xlu0 %581 }
 0x1d0   :  { %v1563_v30 = vpop.permute.xlu1 %587 }
 0x1d4   :  { %v586_v16 = vpop.permute.xlu0 %585 }
 0x1d8   :  { %v1565_v20 = vpop.permute.xlu1 %591 }
 0x1db   :  { %v1567_v27 = vpop.permute.xlu0 %593 }
 0x1dc   :  { %v851_v55 = vpop.permute.xlu1 %850 }
 0x1e0   :  { %v1569_v26 = vpop.permute.xlu1 %862  ;;  %v1571_v35 = vpop.permute.xlu0 %597 }
 0x1e4   :  { %v321_v9 = vpop.permute.xlu1 %320 }
 0x1e5   :  { %v344_v7 = vsel %vm342_vm2, %v321_v9, %v323_v21 }
 0x1e6   :  { %v360_v54 = vsel %vm1575_vm4, %v344_v7, 0.0 }
 0x1e7   :  { %v857_v19 = vpop.permute.xlu0 %856 }
 0x1e8   :  { %v325_v33 = vpop.permute.xlu1 %324 }
 0x1eb   :  { %v319_v5 = vpop.permute.xlu0 %318 }
 0x1ec   :  { %v333_v10 = vpop.permute.xlu1 %332  ;;  %v343_v18 = vsel %vm342_vm2, %v319_v5, %v321_v9 }
 0x1ed   :  { %v359_v61 = vsel %vm1580_vm5, %v343_v18, 0.0  ;;  %v348_v22 = vsel %vm342_vm2, %v333_v10, %v335_v62 }
 0x1ee   :  { %v364_v42 = vsel %vm1575_vm4, %v348_v22, 0.0 }
 0x1ef   :  { %v327_v13 = vpop.permute.xlu0 %326 }
 0x1f0   :  { %v337_v31 = vpop.permute.xlu1 %336  ;;  %v345_v63 = vsel %vm342_vm2, %v325_v33, %v327_v13  ;;  %v346_v3 = vsel %vm342_vm2, %v327_v13, %v329_v46 }
 0x1f1   :  { %v361_v2 = vsel %vm1580_vm5, %v345_v63, 0.0  ;;  %v362_v58 = vsel %vm1575_vm4, %v346_v3, 0.0 }
 0x1f3   :  { %v331_v23 = vpop.permute.xlu0 %330 }
 0x1f4   :  { %v1573_v44 = vpop.permute.xlu1 %338  ;;  %v347_v24 = vsel %vm342_vm2, %v331_v23, %v333_v10 }
 0x1f5   :  { %v363_v9 = vsel %vm1580_vm5, %v347_v24, 0.0  ;;  %v349_v23 = vsel %vm342_vm2, %v337_v31, %v1573_v44 }
 0x1f6   :  { %v365_v22 = vsel %vm1580_vm5, %v349_v23, 0.0 }
 0x1f7   :  { %v578_v28 = vpop.permute.xlu0 %577 }
 0x1f8   :  { %v584_v34 = vpop.permute.xlu1 %583  ;;  %v600_v43 = vsel %vm599_vm3, %v576_v53, %v578_v28  ;;  %v601_v48 = vsel %vm599_vm3, %v578_v28, %v580_v17 }
 0x1f9   :  { %v616_v39 = vadd.f32 %v600_v43, %v359_v61  ;;  %v617_v45 = vadd.f32 %v601_v48, %v360_v54  ;;  %v602_v60 = vsel %vm599_vm3, %v582_v0, %v584_v34  ;;  %v603_v56 = vsel %vm599_vm3, %v584_v34, %v586_v16 }
 0x1fa   :  { %v618_v46 = vadd.f32 %v602_v60, %v361_v2  ;;  %v619_v21 = vadd.f32 %v603_v56, %v362_v58  ;;  %v350_v61 = vsel %vm342_vm2, %v1573_v44, %v1561_v52 }
 0x1fb   :  { %v590_v37 = vpop.permute.xlu0 %589  ;;  %v366_v12 = vsel %vm1575_vm4, %v350_v61, 0.0 }
 0x1fc   :  { %v1585_v40 = vpop.permute.xlu1 %595  ;;  %v604_v17 = vsel %vm599_vm3, %v1563_v30, %v590_v37  ;;  %v605_v30 = vsel %vm599_vm3, %v590_v37, %v1565_v20 }
 0x1fd   :  { %v620_v41 = vadd.f32 %v604_v17, %v363_v9  ;;  %v621_v37 = vadd.f32 %v605_v30, %v364_v42  ;;  %v606_v31 = vsel %vm599_vm3, %v1567_v27, %v1585_v40  ;;  %v607_v3 = vsel %vm599_vm3, %v1585_v40, %v1571_v35 }
 0x1fe   :  { %v623_v56 = vadd.f32 %v607_v3, %v366_v12 }
 0x1ff   :  { %v853_v59 = vpop.permute.xlu0 %852 }
 0x200   :  { %v875_v49 = vsel %vm874_vm6, %v851_v55, %v853_v59  ;;  %v855_v6 = vpop.permute.xlu1 %854 }
 0x201   :  { %v891_v57 = vsel %vm1589_vm7, %v875_v49, 0.0  ;;  %v876_v15 = vsel %vm874_vm6, %v853_v59, %v855_v6 }
 0x202   :  { %v899_v47 = vadd.f32 %v891_v57, %v616_v39  ;;  %v892_v1 = vsel %vm1593_vm8, %v876_v15, 0.0  ;;  %v622_v39 = vadd.f32 %v606_v31, %v365_v22 }
 0x203   :  { %v900_v11 = vadd.f32 %v892_v1, %v617_v45  ;;  %v861_v25 = vpop.permute.xlu0 %860 }
 0x204   :  { %v1620_v53 = vadd.f32 %v1559_v50, %v899_v47  ;;  %v859_v62 = vpop.permute.xlu1 %858 }
 0x205   :  { %v1625_v0 = vadd.f32 %v1559_v50, %v900_v11  ;;  %v877_v16 = vsel %vm874_vm6, %v857_v19, %v859_v62  ;;  %v878_v55 = vsel %vm874_vm6, %v859_v62, %v861_v25 }
 0x206   :  { %v991_v33 = vmul.f32 -1.442695, %v1620_v53  ;;  %v893_v5 = vsel %vm1589_vm7, %v877_v16, 0.0  ;;  %v894_v8 = vsel %vm1593_vm8, %v878_v55, 0.0 }
 0x207   :  { %v992_v10 = vmul.f32 -1.442695, %v1625_v0  ;;  %v901_v13 = vadd.f32 %v893_v5, %v618_v46  ;;  %v902_v19 = vadd.f32 %v894_v8, %v619_v21  ;;  %v865_v32 = vpop.permute.xlu0 %864 }
 0x208   :  { %1031 = vpow2.f32 %v991_v33  ;;  %v879_v28 = vsel %vm874_vm6, %v1569_v26, %v865_v32  ;;  %v867_v36 = vpop.permute.xlu1 %866 }
 0x209   :  { %1033 = vpow2.f32 %v992_v10  ;;  %v1644_v14 = vadd.f32 %v1557_v29, %v901_v13  ;;  %v1647_v20 = vadd.f32 %v1557_v29, %v902_v19  ;;  %v895_v34 = vsel %vm1589_vm7, %v879_v28, 0.0 }
 0x20a   :  { %v903_v7 = vadd.f32 %v895_v34, %v620_v41  ;;  %v880_v18 = vsel %vm874_vm6, %v865_v32, %v867_v36 }
 0x20b   :  { %v993_v26 = vmul.f32 -1.442695, %v1644_v14  ;;  %v994_v43 = vmul.f32 -1.442695, %v1647_v20  ;;  %v896_v48 = vsel %vm1593_vm8, %v880_v18, 0.0  ;;  %v869_v54 = vpop.permute.xlu0 %868 }
 0x20c   :  { %v1665_v27 = vadd.f32 %v1559_v50, %v903_v7  ;;  %v904_v63 = vadd.f32 %v896_v48, %v621_v37  ;;  %v871_v59 = vpop.permute.xlu1 %870 }
 0x20d   :  { %1035 = vpow2.f32 %v993_v26  ;;  %v881_v45 = vsel %vm874_vm6, %v869_v54, %v871_v59 }
 0x20e   :  { %1037 = vpow2.f32 %v994_v43  ;;  %v995_v49 = vmul.f32 -1.442695, %v1665_v27  ;;  %v920_v52 = vadd.f32 %v1559_v50, %v904_v63  ;;  %v897_v44 = vsel %vm1589_vm7, %v881_v45, 0.0 }
 0x20f   :  { %v905_v6 = vadd.f32 %v897_v44, %v622_v39  ;;  %v873_v60 = vpop.permute.xlu0 %872 }
 0x210   :  { %1039 = vpow2.f32 %v995_v49  ;;  %v996_v35 = vmul.f32 -1.442695, %v920_v52  ;;  %v882_v40 = vsel %vm874_vm6, %v871_v59, %v873_v60 }
 0x211   :  { %v921_v57 = vadd.f32 %v1557_v29, %v905_v6  ;;  %v898_v15 = vsel %vm1593_vm8, %v882_v40, 0.0 }
 0x212   :  { %v1032_v47 = vpop.eup %1031  ;;  %1041 = vpow2.f32 %v996_v35  ;;  %v906_v50 = vadd.f32 %v898_v15, %v623_v56 }
 0x213   :  { %v1034_v51 = vpop.eup %1033  ;;  %v947_v1 = vadd.f32 1.0, %v1032_v47  ;;  %v997_v2 = vmul.f32 -1.442695, %v921_v57 }
 0x214   :  { %v948_v38 = vadd.f32 1.0, %v1034_v51  ;;  %v922_v58 = vadd.f32 %v1557_v29, %v906_v50 }
 0x215   :  { %1043 = vrcp.f32 %v947_v1 }
 0x216   :  { %1045 = vrcp.f32 %v948_v38  ;;  %v998_v24 = vmul.f32 -1.442695, %v922_v58 }
 0x217   :  { %v1036_v11 = vpop.eup %1035  ;;  %1047 = vpow2.f32 %v997_v2 }
 0x218   :  { %v1038_v25 = vpop.eup %1037  ;;  %v949_v42 = vadd.f32 1.0, %v1036_v11  ;;  %1049 = vpow2.f32 %v998_v24 }
 0x219   :  { %v950_v46 = vadd.f32 1.0, %v1038_v25 }
 0x21a   :  { %v1040_v4 = vpop.eup %1039  ;;  %1051 = vrcp.f32 %v949_v42 }
 0x21b   :  { %1053 = vrcp.f32 %v950_v46  ;;  %v951_v21 = vadd.f32 1.0, %v1040_v4 }
 0x21c   :  { %v1042_v62 = vpop.eup %1041 }
 0x21d   :  { %1055 = vrcp.f32 %v951_v21  ;;  %v952_v17 = vadd.f32 1.0, %v1042_v62 }
 0x21f   :  { %v1044_v16 = vpop.eup %1043  ;;  %1057 = vrcp.f32 %v952_v17 }
 0x220   :  { %v1046_v55 = vpop.eup %1045  ;;  %v971_v29 = vmul.f32 %v1044_v16, %v1620_v53 }
 0x221   :  { %v1048_v9 = vpop.eup %1047  ;;  %v972_v33 = vmul.f32 %v1046_v55, %v1625_v0 }
 0x222   :  { %v1050_v5 = vpop.eup %1049  ;;  %979 = vst [vmem:[%s1713_s2] sm:$0xff] %v971_v29  ;;  %v953_v8 = vadd.f32 1.0, %v1048_v9 }
 0x223   :  { %980 = vst [vmem:[%s1713_s2 + $0x8] sm:$0xff] %v972_v33  ;;  %v954_v30 = vadd.f32 1.0, %v1050_v5 }
 0x224   :  { %v1052_v10 = vpop.eup %1051  ;;  %1059 = vrcp.f32 %v953_v8 }
 0x225   :  { %v1054_v13 = vpop.eup %1053  ;;  %v973_v19 = vmul.f32 %v1052_v10, %v1644_v14  ;;  %1061 = vrcp.f32 %v954_v30 }
 0x226   :  { %v974_v53 = vmul.f32 %v1054_v13, %v1647_v20 }
 0x227   :  { %v1056_v0 = vpop.eup %1055  ;;  %981 = vst [vmem:[%s1713_s2 + $0x10] sm:$0xff] %v973_v19 }
 0x228   :  { %982 = vst [vmem:[%s1713_s2 + $0x18] sm:$0xff] %v974_v53  ;;  %v975_v32 = vmul.f32 %v1056_v0, %v1665_v27 }
 0x229   :  { %v1058_v23 = vpop.eup %1057 }
 0x22a   :  { %983 = vst [vmem:[%s1713_s2 + $0x20] sm:$0xff] %v975_v32  ;;  %v976_v41 = vmul.f32 %v1058_v23, %v920_v52 }
 0x22c   :  { %984 = vst [vmem:[%s1713_s2 + $0x28] sm:$0xff] %v976_v41 }
 0x22e   :  { %v1060_v28 = vpop.eup %1059 }
 0x22f   :  { %v1062_v36 = vpop.eup %1061  ;;  %v977_v14 = vmul.f32 %v1060_v28, %v921_v57 }
 0x230   :  { %v978_v20 = vmul.f32 %v1062_v36, %v922_v58 }
 0x231   :  { %985 = vst [vmem:[%s1713_s2 + $0x30] sm:$0xff] %v977_v14 }
 0x232   :  { %986 = vst [vmem:[%s1713_s2 + $0x38] sm:$0xff] %v978_v20 }

</bundles_post_ra>
